<compile_context>
chip_gen: v5e
topology: v5e:2x2
jax: 0.10.0
libtpu: 0.0.40
codegen_flags: <defaults>
</compile_context>

<pallas_src>
import functools

import jax
import jax.numpy as jnp
from jax.experimental import pallas as pl
from jax.experimental.pallas import tpu as pltpu


def _cdiv(a, b):
    return -(-a // b)


def _round_up(a, b):
    return _cdiv(a, b) * b


def _bce_partial_sum_kernel(x_ref, y_ref, out_ref, acc_ref, *,
                            num_rows, block_rows, blocks_per_part):
    i = pl.program_id(0)   # parallel part (TensorCore split on v7x)
    j = pl.program_id(1)   # row-block within this part (reduction axis)

    @pl.when(j == 0)
    def _():
        acc_ref[...] = jnp.zeros_like(acc_ref)

    x = x_ref[...].astype(jnp.float32)
    y = y_ref[...].astype(jnp.float32)   # mirrors `y.float()`

    # Numerically stable BCE-with-logits (matches torch.nn.BCEWithLogitsLoss):
    #   loss = max(x, 0) - x*y + log(1 + exp(-|x|))
    per_elem = jnp.maximum(x, 0.0) - x * y + jnp.log1p(jnp.exp(-jnp.abs(x)))

    # Mask padded rows (global row index >= true batch size).
    row_start = (i * blocks_per_part + j) * block_rows
    row_ids = row_start + jax.lax.broadcasted_iota(jnp.int32, per_elem.shape, 0)
    per_elem = jnp.where(row_ids < num_rows, per_elem, 0.0)

    # Sublane-grouped partial reduce into the vreg-shaped accumulator:
    # just vreg-wise VPU adds, no cross-lane (XLU) work inside the hot loop.
    acc_ref[...] += per_elem.reshape(block_rows // 8, 8, -1).sum(axis=0)

    @pl.when(j == pl.num_programs(1) - 1)
    def _():
        out_ref[...] = acc_ref[...]


def fashion_loss(y_pred, y, *,
                 input_vmem_budget_bytes=12 * 1024 * 1024,
                 max_block_rows=4096):
    """BCEWithLogitsLoss with mean reduction, computed in a Pallas TPU kernel."""
    B, C = y_pred.shape
    assert y.shape == (B, C)

    # `y.float()` happens inside the kernel; shrink HBM traffic on the way in:
    # integer / bool 0-1 labels travel as int8 (lossless), float targets keep
    # their dtype (no precision change).
    if jnp.issubdtype(y.dtype, jnp.integer) or y.dtype == jnp.bool_:
        y = y.astype(jnp.int8)

    _G = 32  # sublane granule that is tile-safe for f32 / bf16 / int8 blocks

    # Largest row-block whose double-buffered input tiles fit the VMEM budget.
    bytes_per_row = C * (y_pred.dtype.itemsize + y.dtype.itemsize)
    block_rows = input_vmem_budget_bytes // (2 * bytes_per_row)
    block_rows = int(min(block_rows, max_block_rows))
    block_rows = max(_G, (block_rows // _G) * _G)

    # Split the row range across (up to) two TensorCores for v7x megacore.
    num_parts = 2 if B >= 2 * _G else 1
    rows_per_part = _cdiv(B, num_parts)
    block_rows = min(block_rows, _round_up(rows_per_part, _G))
    blocks_per_part = _cdiv(rows_per_part, block_rows)
    # Re-balance block_rows so padding waste is at most one granule per part.
    block_rows = _round_up(_cdiv(rows_per_part, blocks_per_part), _G)

    padded_B = num_parts * blocks_per_part * block_rows
    if padded_B != B:
        pad = padded_B - B
        y_pred = jnp.pad(y_pred, ((0, pad), (0, 0)))
        y = jnp.pad(y, ((0, pad), (0, 0)))

    kernel = functools.partial(
        _bce_partial_sum_kernel,
        num_rows=B, block_rows=block_rows, blocks_per_part=blocks_per_part)

    in_map = lambda i, j: (i * blocks_per_part + j, 0)

    partial_sums = pl.pallas_call(
        kernel,
        out_shape=jax.ShapeDtypeStruct((num_parts, 8, C), jnp.float32),
        grid_spec=pltpu.PrefetchScalarGridSpec(
            num_scalar_prefetch=0,
            grid=(num_parts, blocks_per_part),
            in_specs=[
                pl.BlockSpec((block_rows, C), in_map),
                pl.BlockSpec((block_rows, C), in_map),
            ],
            out_specs=pl.BlockSpec((None, 8, C), lambda i, j: (i, 0, 0)),
            scratch_shapes=[pltpu.VMEM((8, C), jnp.float32)],
        ),
        compiler_params=pltpu.CompilerParams(
            dimension_semantics=("parallel", "arbitrary"),
            vmem_limit_bytes=32 * 1024 * 1024,
        ),
    )(y_pred, y)

    # Tiny epilogue: reduce the lane-dense per-core partials and take the mean.
    return jnp.sum(partial_sums) / jnp.float32(B * C)


def _reference_bce_with_logits_mean(x, y):
    x = x.astype(jnp.float32)
    y = y.astype(jnp.float32)
    per_elem = jnp.maximum(x, 0.0) - x * y + jnp.log1p(jnp.exp(-jnp.abs(x)))
    return jnp.mean(per_elem)


if __name__ == "__main__":
    key = jax.random.PRNGKey(0)
    k1, k2, k3, k4 = jax.random.split(key, 4)

    # Small multilabel problem: 16 samples, 128 labels (0/1 integer targets).
    B, C = 16, 128
    y_pred = jax.random.normal(k1, (B, C), dtype=jnp.float32)
    y = jax.random.bernoulli(k2, 0.3, (B, C)).astype(jnp.int32)

    loss = jax.block_until_ready(fashion_loss(y_pred, y))
    ref = _reference_bce_with_logits_mean(y_pred, y)
    assert jnp.allclose(loss, ref, atol=1e-5, rtol=1e-5), (loss, ref)

    # Non-divisible batch exercises the padding + row-mask path.
    B2, C2 = 13, 128
    y_pred2 = jax.random.normal(k3, (B2, C2), dtype=jnp.float32)
    y2 = jax.random.bernoulli(k4, 0.5, (B2, C2)).astype(jnp.float32)
    loss2 = jax.block_until_ready(fashion_loss(y_pred2, y2))
    ref2 = _reference_bce_with_logits_mean(y_pred2, y2)
    assert jnp.allclose(loss2, ref2, atol=1e-5, rtol=1e-5), (loss2, ref2)

    print("KERNEL_OK")
</pallas_src>

<mosaic_0001>
module attributes {stable_mosaic.version = 11 : i64} {
  func.func @_bce_partial_sum_kernel(%arg0: i32, %arg1: i32, %arg2: memref<32x128xf32, #tpu.memory_space<vmem>>, %arg3: memref<32x128xi8, #tpu.memory_space<vmem>>, %arg4: memref<1x8x128xf32, #tpu.memory_space<vmem>>, %arg5: memref<8x128xf32, #tpu.memory_space<vmem>>) attributes {dimension_semantics = [#tpu.dimension_semantics<parallel>, #tpu.dimension_semantics<arbitrary>], iteration_bounds = array<i64: 1, 1>, scalar_prefetch = 0 : i64, scratch_operands = 1 : i64, tpu.core_type = #tpu.core_type<tc>, window_params = [{transform_indices = @transform_0, window_bounds = array<i64: 32, 128>}, {transform_indices = @transform_1, window_bounds = array<i64: 32, 128>}, {transform_indices = @transform_2, window_bounds = array<i64: 1, 8, 128>}]} {
    %c0_i32 = arith.constant 0 : i32
    %0 = arith.cmpi eq, %arg1, %c0_i32 : i32
    %1 = arith.extui %0 : i1 to i32
    %c0_i32_0 = arith.constant 0 : i32
    %2 = arith.cmpi ne, %1, %c0_i32_0 : i32
    scf.if %2 {
      %cst_13 = arith.constant 0.000000e+00 : f32
      %34 = vector.broadcast %cst_13 : f32 to vector<8x128xf32>
      %c0_14 = arith.constant 0 : index
      %c0_15 = arith.constant 0 : index
      %35 = vector.load %arg5[%c0_14, %c0_15] : memref<8x128xf32, #tpu.memory_space<vmem>>, vector<8x128xf32>
      tpu.vector_store %arg5[%c0_14, %c0_15], %34 {strides = array<i32>} : memref<8x128xf32, #tpu.memory_space<vmem>>, vector<8x128xf32>,
    } else {
    }
    %c0 = arith.constant 0 : index
    %c0_1 = arith.constant 0 : index
    %3 = vector.load %arg2[%c0, %c0_1] : memref<32x128xf32, #tpu.memory_space<vmem>>, vector<32x128xf32>
    %c0_2 = arith.constant 0 : index
    %c0_3 = arith.constant 0 : index
    %4 = vector.load %arg3[%c0_2, %c0_3] : memref<32x128xi8, #tpu.memory_space<vmem>>, vector<32x128xi8>
    %5 = arith.sitofp %4 : vector<32x128xi8> to vector<32x128xf32>
    %cst = arith.constant 0.000000e+00 : f32
    %6 = vector.broadcast %cst : f32 to vector<32x128xf32>
    %7 = arith.maximumf %3, %6 : vector<32x128xf32>
    %8 = arith.mulf %3, %5 : vector<32x128xf32>
    %9 = arith.subf %7, %8 : vector<32x128xf32>
    %10 = math.absf %3 : vector<32x128xf32>
    %cst_4 = arith.constant 0.000000e+00 : f32
    %11 = vector.broadcast %cst_4 : f32 to vector<32x128xf32>
    %12 = arith.subf %11, %10 : vector<32x128xf32>
    %13 = math.exp %12 : vector<32x128xf32>
    %14 = math.log1p %13 : vector<32x128xf32>
    %15 = arith.addf %9, %14 : vector<32x128xf32>
    %c1_i32 = arith.constant 1 : i32
    %16 = arith.muli %arg0, %c1_i32 : i32
    %17 = arith.addi %16, %arg1 : i32
    %c32_i32 = arith.constant 32 : i32
    %18 = arith.muli %17, %c32_i32 : i32
    %19 = tpu.iota {dimensions = array<i32: 0>} : vector<32x128xi32>
    %20 = vector.broadcast %18 : i32 to vector<32x128xi32>
    %21 = arith.addi %20, %19 : vector<32x128xi32>
    %c16_i32 = arith.constant 16 : i32
    %22 = vector.broadcast %c16_i32 : i32 to vector<32x128xi32>
    %23 = arith.cmpi slt, %21, %22 : vector<32x128xi32>
    %cst_5 = arith.constant 0.000000e+00 : f32
    %24 = vector.broadcast %cst_5 : f32 to vector<32x128xf32>
    %25 = arith.select %23, %15, %24 : vector<32x128xi1>, vector<32x128xf32>
    %c0_6 = arith.constant 0 : index
    %c0_7 = arith.constant 0 : index
    %26 = vector.load %arg5[%c0_6, %c0_7] : memref<8x128xf32, #tpu.memory_space<vmem>>, vector<8x128xf32>
    %27 = vector.shape_cast %25 : vector<32x128xf32> to vector<4x8x128xf32>
    %cst_8 = arith.constant dense<0.000000e+00> : vector<8x128xf32>
    %28 = vector.multi_reduction <add>, %27, %cst_8 [0] : vector<4x8x128xf32> to vector<8x128xf32>
    %29 = arith.addf %26, %28 : vector<8x128xf32>
    %c0_9 = arith.constant 0 : index
    %c0_10 = arith.constant 0 : index
    %30 = vector.load %arg5[%c0_9, %c0_10] : memref<8x128xf32, #tpu.memory_space<vmem>>, vector<8x128xf32>
    tpu.vector_store %arg5[%c0_9, %c0_10], %29 {strides = array<i32>} : memref<8x128xf32, #tpu.memory_space<vmem>>, vector<8x128xf32>,
    %c0_i32_11 = arith.constant 0 : i32
    %31 = arith.cmpi eq, %arg1, %c0_i32_11 : i32
    %32 = arith.extui %31 : i1 to i32
    %c0_i32_12 = arith.constant 0 : i32
    %33 = arith.cmpi ne, %32, %c0_i32_12 : i32
    scf.if %33 {
      %c0_13 = arith.constant 0 : index
      %c0_14 = arith.constant 0 : index
      %34 = vector.load %arg5[%c0_13, %c0_14] : memref<8x128xf32, #tpu.memory_space<vmem>>, vector<8x128xf32>
      %c0_15 = arith.constant 0 : index
      %c0_16 = arith.constant 0 : index
      %c0_17 = arith.constant 0 : index
      %35 = vector.load %arg4[%c0_15, %c0_16, %c0_17] : memref<1x8x128xf32, #tpu.memory_space<vmem>>, vector<1x8x128xf32>
      %36 = vector.shape_cast %35 : vector<1x8x128xf32> to vector<8x128xf32>
      %37 = vector.shape_cast %34 : vector<8x128xf32> to vector<1x8x128xf32>
      tpu.vector_store %arg4[%c0_15, %c0_16, %c0_17], %37 {strides = array<i32>} : memref<1x8x128xf32, #tpu.memory_space<vmem>>, vector<1x8x128xf32>,
    } else {
    }
    return
  }
  func.func @transform_0(%arg0: i32, %arg1: i32) -> (i32, i32) {
    %c1_i32 = arith.constant 1 : i32
    %0 = arith.muli %arg0, %c1_i32 : i32
    %1 = arith.addi %0, %arg1 : i32
    %c0_i32 = arith.constant 0 : i32
    %c0_i32_0 = arith.constant 0 : i32
    return %1, %c0_i32 : i32, i32
  }
  func.func @transform_1(%arg0: i32, %arg1: i32) -> (i32, i32) {
    %c1_i32 = arith.constant 1 : i32
    %0 = arith.muli %arg0, %c1_i32 : i32
    %1 = arith.addi %0, %arg1 : i32
    %c0_i32 = arith.constant 0 : i32
    %c0_i32_0 = arith.constant 0 : i32
    return %1, %c0_i32 : i32, i32
  }
  func.func @transform_2(%arg0: i32, %arg1: i32) -> (i32, i32, i32) {
    %c0_i32 = arith.constant 0 : i32
    %c0_i32_0 = arith.constant 0 : i32
    %c0_i32_1 = arith.constant 0 : i32
    return %arg0, %c0_i32, %c0_i32_0 : i32, i32, i32
  }
}

</mosaic_0001>

<bundles_post_ra>
// kernel: tpu_custom_call.1
= control target key start
LH: loop header
LB: loop body
LE: loop exit
PB: predicated region body
PF: predicated region fallthrough
CT: control target
= control target key end

     0   :  { %7 = vsyncpa [#allocation4], 0  ;;  %s307_s0 = inlined_call_operand.hbm [shape: f32[32,128], index: 0, kind: input, shape index: {}]   ;;  %s308_s1 = inlined_call_operand.hbm [shape: s8[32,128], index: 1, kind: input, shape index: {}]   ;;  %s309_s2 = inlined_call_operand.hbm [shape: f32[1,8,128], index: 2, kind: output, shape index: {}]  }
   0x1   :  { %8 = vsyncpa [#allocation7], 0 }
   0x2   :  { %9 = vsyncpa [#allocation5], 0  ;;  %s18_s11 = sshll.u32 %s307_s0, 4  ;;  %s278_s12 = smov [#allocation3]   ;;  %s19_s11 = int_to_ptr.hbm [resolvable:$true] %s18_s11 }
   0x3   :  { %s20_s13 = sshll.u32 %s278_s12, 4  ;;  %s35_s16 = sshll.u32 %s308_s1, 4  ;;  %s21_s13 = int_to_ptr.vmem [resolvable:$true] %s20_s13  ;;  %s36_s16 = int_to_ptr.hbm [resolvable:$true] %s35_s16 }
   0x4   :  { %s279_s17 = smov 128   ;;  %s280_s18 = smov 8  }
   0x5   :  { %26 = dma.hbm_to_vmem [thread:$0]  %s19_s11, 512, %s21_s13, [#allocation4], %s279_s17, %s279_s17, %s280_s18  }
   0x6   :  { %s281_s19 = smov [#allocation6]  }
   0x7   :  { %s37_s20 = sshll.u32 %s281_s19, 4  ;;  %s38_s20 = int_to_ptr.vmem [resolvable:$true] %s37_s20 }
   0x8   :  { %40 = dma.hbm_to_vmem [thread:$0]  %s36_s16, 128, %s38_s20, [#allocation7]  }
   0x9   :  { %272 = dma.done.wait [#allocation4], 512  }
   0xa   :  { %273 = vsyncadd [#allocation4], 4294966784 }
   0xb   :  { %274 = dma.done.wait [#allocation7], 128  }
   0xc   :  { %275 = vsyncadd [#allocation7], 4294967168  ;;  %v57_v0 = vld [vmem:[#allocation3] sm:$0xff]  ;;  %v58_v1 = vld [vmem:[#allocation3 + $0x8] sm:$0xff]  ;;  %s282_s0 = smov [#allocation8]   ;;  %s176_s23 = sshll.u32 %s309_s2, 4  ;;  %s177_s23 = int_to_ptr.hbm [resolvable:$true] %s176_s23 }
   0xd   :  { %v82_v2 = vand.u32 2147483647, %v57_v0  ;;  %v83_v3 = vand.u32 2147483647, %v58_v1  ;;  %v61_v8 = vld [vmem:[#allocation6] sm:$0xff]  ;;  %v70_v20 = vmax.f32 %v57_v0, 0.0 }
   0xe   :  { %v62_v9 = vunpack.c.0.s8 %v61_v8  ;;  %v63_v10 = vunpack.c.1.s8 %v61_v8  ;;  %v71_v24 = vmax.f32 %v58_v1, 0.0  ;;  %s174_s1 = sshll.u32 %s282_s0, 4  ;;  %s175_s1 = int_to_ptr.vmem [resolvable:$true] %s174_s1 }
   0xf   :  { %v86_v4 = vsub.f32 0.0, %v82_v2  ;;  %v87_v5 = vsub.f32 0.0, %v83_v3 }
  0x10   :  { %v66_v13 = vcvt.s32.f32 %v62_v9  ;;  %v67_v16 = vcvt.s32.f32 %v63_v10 }
  0x11   :  { %v90_v6 = vmul.f32 1.442695, %v86_v4  ;;  %v92_v7 = vmul.f32 1.442695, %v87_v5 }
  0x12   :  { %v74_v21 = vmul.f32 %v66_v13, %v57_v0  ;;  %v75_v25 = vmul.f32 %v67_v16, %v58_v1 }
  0x13   :  { %192 = vpow2.f32 %v90_v6 }
  0x14   :  { %194 = vpow2.f32 %v92_v7  ;;  %v78_v29 = vsub.f32 %v70_v20, %v74_v21  ;;  %v79_v32 = vsub.f32 %v71_v24, %v75_v25 }
  0x19   :  { %v193_v11 = vpop.eup %192 }
  0x1a   :  { %v195_v12 = vpop.eup %194  ;;  %v98_v14 = vadd.f32 1.0, %v193_v11  ;;  %v101_v15 = vmul.f32 -0.5, %v193_v11  ;;  %v104_v22 = vand.u32 2147483647, %v193_v11 }
  0x1b   :  { %v107_v17 = vadd.f32 1.0, %v195_v12  ;;  %v110_v18 = vmul.f32 -0.5, %v195_v12  ;;  %v113_v26 = vand.u32 2147483647, %v195_v12 }
  0x1c   :  { %196 = vlog2.f32 %v98_v14  ;;  %v102_v19 = vadd.f32 1.0, %v101_v15  ;;  %vm105_vm0 = vcmp.lt.f32.partialorder %v104_v22, 0.0004427343 }
  0x1d   :  { %198 = vlog2.f32 %v107_v17  ;;  %v111_v23 = vadd.f32 1.0, %v110_v18  ;;  %vm114_vm1 = vcmp.lt.f32.partialorder %v113_v26, 0.0004427343 }
  0x1e   :  { %v103_v27 = vmul.f32 %v193_v11, %v102_v19 }
  0x1f   :  { %v112_v30 = vmul.f32 %v195_v12, %v111_v23 }
  0x22   :  { %v197_v28 = vpop.eup %196 }
  0x23   :  { %v199_v31 = vpop.eup %198  ;;  %v100_v33 = vmul.f32 0.6931472, %v197_v28 }
  0x24   :  { %v109_v34 = vmul.f32 0.6931472, %v199_v31 }
  0x25   :  { %v106_v35 = vsel %vm105_vm0, %v103_v27, %v100_v33 }
  0x26   :  { %v115_v36 = vsel %vm114_vm1, %v112_v30, %v109_v34  ;;  %v134_v37 = vadd.f32 %v106_v35, %v78_v29 }
  0x27   :  { %v135_v38 = vadd.f32 %v115_v36, %v79_v32 }
  0x29   :  { %v159_v39 = vadd.f32 %v135_v38, %v134_v37 }
  0x2b   :  { %168 = vst [vmem:[#allocation8] sm:$0xff] %v159_v39 }
  0x2c   :  { %179 = dma.vmem_to_hbm [thread:$0]  %s175_s1, 128, %s177_s23, [#allocation5]  }
  0x2d   :  { %276 = dma.done.wait [#allocation5], 128  }
  0x2e   :  { %277 = vsyncadd [#allocation5], 4294967168 }
  0x2f   :  { %184 = vsyncpa [#allocation4], 1 }
  0x30   :  { %185 = vsyncpa [#allocation7], 1 }
  0x31   :  { %186 = vsyncpa [#allocation5], 1 }

</bundles_post_ra>
